<compile_context>
chip_gen: v6e
topology: v6e:2x2x1
jax: 0.10.0
libtpu: 0.0.40
codegen_flags: <defaults>
</compile_context>

<pallas_src>
import jax
import jax.numpy as jnp
from jax.experimental import pallas as pl
from jax.experimental.pallas import tpu as pltpu

# ----- module configuration (small, deterministic, synthetic) -----
INPUT_SHAPE = (16,)          # input_shape of the surrogate
C1_SHAPE = (1,)              # concentration1_shape
C0_SHAPE = (1,)              # concentration0_shape
C1_DIM = 1                   # prod(C1_SHAPE)
C0_DIM = 1                   # prod(C0_SHAPE)
HIDDEN_DIM = 32
D_IN = 16                    # prod(INPUT_SHAPE)
D_OUT = C1_DIM + C0_DIM      # feed-forward output dim
BATCH = 2

# Batch tile: multiple of 8 sublanes, amortizes per-step overhead once the
# batch is large; tiny batches are zero-padded up to one tile.
TILE_B = 128


def _surrogate_beta_kernel(x_ref, w1_ref, b1_ref, w2_ref, b2_ref, out_ref):
    """Fused 2-layer MLP + exp; emits the full (TILE_B, D_OUT) activation."""
    x = x_ref[...]                                            # (TILE_B, D_IN)
    h = jnp.dot(x, w1_ref[...],
                preferred_element_type=jnp.float32) + b1_ref[...]
    h = jnp.maximum(h, 0.0)                                   # ReLU
    out = jnp.dot(h, w2_ref[...],
                  preferred_element_type=jnp.float32) + b2_ref[...]
    out_ref[...] = jnp.exp(out)                               # single fused store


def surrogate_beta_forward(x, w1, b1, w2, b2):
    """Returns (concentration1, concentration0) of the Beta distribution."""
    batch = x.shape[0]
    x_flat = x.reshape(batch, -1).astype(jnp.float32)
    b1_2d = b1.reshape(1, HIDDEN_DIM).astype(jnp.float32)
    b2_2d = b2.reshape(1, D_OUT).astype(jnp.float32)

    # Pad batch to a whole number of tiles so blocks stay (8,128)-aligned.
    n_tiles = pl.cdiv(batch, TILE_B)
    b_pad = n_tiles * TILE_B
    if b_pad != batch:
        x_flat = jnp.pad(x_flat, ((0, b_pad - batch), (0, 0)))

    y = pl.pallas_call(
        _surrogate_beta_kernel,
        out_shape=jax.ShapeDtypeStruct((b_pad, D_OUT), jnp.float32),
        grid=(n_tiles,),
        in_specs=[
            # batch-tiled activations
            pl.BlockSpec((TILE_B, D_IN), lambda i: (i, 0)),
            # weights / biases stay resident (constant block index)
            pl.BlockSpec((D_IN, HIDDEN_DIM), lambda i: (0, 0)),
            pl.BlockSpec((1, HIDDEN_DIM), lambda i: (0, 0)),
            pl.BlockSpec((HIDDEN_DIM, D_OUT), lambda i: (0, 0)),
            pl.BlockSpec((1, D_OUT), lambda i: (0, 0)),
        ],
        out_specs=pl.BlockSpec((TILE_B, D_OUT), lambda i: (i, 0)),
        compiler_params=pltpu.CompilerParams(
            dimension_semantics=("parallel",)),   # shard batch tiles on v7x's 2 TCs
    )(x_flat, w1.astype(jnp.float32), b1_2d, w2.astype(jnp.float32), b2_2d)

    y = y[:batch]
    # Split in the wrapper (free XLA slices).  Indexing matches the PyTorch
    # source: x[:, :c1_dim] and x[:, c0_dim:]  (c1_dim == c0_dim here).
    concentration1 = y[:, :C1_DIM].reshape(batch, *C1_SHAPE)
    concentration0 = y[:, C0_DIM:].reshape(batch, *C0_SHAPE)
    # TODO(synk): the Beta distribution object itself (log_prob etc.) has no
    # Pallas equivalent; we return its parameters, which is what forward computes.
    return concentration1, concentration0


def _reference(x, w1, b1, w2, b2):
    batch = x.shape[0]
    xf = x.reshape(batch, -1)
    h = jnp.maximum(xf @ w1 + b1, 0.0)
    out = h @ w2 + b2
    return (jnp.exp(out[:, :C1_DIM]).reshape(batch, *C1_SHAPE),
            jnp.exp(out[:, C0_DIM:]).reshape(batch, *C0_SHAPE))


if __name__ == "__main__":
    key = jax.random.PRNGKey(0)
    kx, k1, k2, k3, k4 = jax.random.split(key, 5)

    x = jax.random.normal(kx, (BATCH,) + INPUT_SHAPE, dtype=jnp.float32)
    # deterministic parameter init (synthetic, not a checkpoint load)
    w1 = jax.random.normal(k1, (D_IN, HIDDEN_DIM), dtype=jnp.float32) * 0.1
    b1 = jax.random.normal(k2, (HIDDEN_DIM,), dtype=jnp.float32) * 0.1
    w2 = jax.random.normal(k3, (HIDDEN_DIM, D_OUT), dtype=jnp.float32) * 0.1
    b2 = jax.random.normal(k4, (D_OUT,), dtype=jnp.float32) * 0.1

    c1, c0 = surrogate_beta_forward(x, w1, b1, w2, b2)
    jax.block_until_ready((c1, c0))

    r1, r0 = _reference(x, w1, b1, w2, b2)
    assert c1.shape == (BATCH,) + C1_SHAPE and c0.shape == (BATCH,) + C0_SHAPE
    assert jnp.allclose(c1, r1, rtol=1e-5, atol=1e-5)
    assert jnp.allclose(c0, r0, rtol=1e-5, atol=1e-5)

    # sanity-check the batch-tiling path with a batch larger than one tile
    xb = jax.random.normal(kx, (300,) + INPUT_SHAPE, dtype=jnp.float32)
    cb1, cb0 = surrogate_beta_forward(xb, w1, b1, w2, b2)
    jax.block_until_ready((cb1, cb0))
    rb1, rb0 = _reference(xb, w1, b1, w2, b2)
    assert jnp.allclose(cb1, rb1, rtol=1e-5, atol=1e-5)
    assert jnp.allclose(cb0, rb0, rtol=1e-5, atol=1e-5)

    print("KERNEL_OK")
</pallas_src>

<mosaic_0001>
module attributes {stable_mosaic.version = 11 : i64} {
  func.func @_surrogate_beta_kernel(%arg0: i32, %arg1: memref<128x16xf32, #tpu.memory_space<vmem>>, %arg2: memref<16x32xf32, #tpu.memory_space<vmem>>, %arg3: memref<1x32xf32, #tpu.memory_space<vmem>>, %arg4: memref<32x2xf32, #tpu.memory_space<vmem>>, %arg5: memref<1x2xf32, #tpu.memory_space<vmem>>, %arg6: memref<128x2xf32, #tpu.memory_space<vmem>>) attributes {dimension_semantics = [#tpu.dimension_semantics<parallel>], iteration_bounds = array<i64: 1>, scalar_prefetch = 0 : i64, scratch_operands = 0 : i64, tpu.core_type = #tpu.core_type<tc>, window_params = [{transform_indices = @transform_0, window_bounds = array<i64: 128, 16>}, {pipeline_mode = #tpu.pipeline_mode<synchronous>, transform_indices = @transform_1, window_bounds = array<i64: 16, 32>}, {pipeline_mode = #tpu.pipeline_mode<synchronous>, transform_indices = @transform_2, window_bounds = array<i64: 1, 32>}, {pipeline_mode = #tpu.pipeline_mode<synchronous>, transform_indices = @transform_3, window_bounds = array<i64: 32, 2>}, {pipeline_mode = #tpu.pipeline_mode<synchronous>, transform_indices = @transform_4, window_bounds = array<i64: 1, 2>}, {transform_indices = @transform_5, window_bounds = array<i64: 128, 2>}]} {
    %c0 = arith.constant 0 : index
    %c0_0 = arith.constant 0 : index
    %0 = vector.load %arg1[%c0, %c0_0] : memref<128x16xf32, #tpu.memory_space<vmem>>, vector<128x16xf32>
    %c0_1 = arith.constant 0 : index
    %c0_2 = arith.constant 0 : index
    %1 = vector.load %arg2[%c0_1, %c0_2] : memref<16x32xf32, #tpu.memory_space<vmem>>, vector<16x32xf32>
    %cst = arith.constant dense<0.000000e+00> : vector<128x32xf32>
    %2 = tpu.matmul %0, %1, %cst {dimension_numbers = #tpu.dot_dimension_numbers<[1], [0], [0], [1], [0, 0, 1, 1], [], []>} : vector<128x16xf32>, vector<16x32xf32>, vector<128x32xf32> -> vector<128x32xf32>
    %c0_3 = arith.constant 0 : index
    %c0_4 = arith.constant 0 : index
    %3 = vector.load %arg3[%c0_3, %c0_4] : memref<1x32xf32, #tpu.memory_space<vmem>>, vector<1x32xf32>
    %4 = vector.broadcast %3 : vector<1x32xf32> to vector<128x32xf32>
    %5 = arith.addf %2, %4 : vector<128x32xf32>
    %cst_5 = arith.constant 0.000000e+00 : f32
    %6 = vector.broadcast %cst_5 : f32 to vector<128x32xf32>
    %7 = arith.maximumf %5, %6 : vector<128x32xf32>
    %c0_6 = arith.constant 0 : index
    %c0_7 = arith.constant 0 : index
    %8 = vector.load %arg4[%c0_6, %c0_7] : memref<32x2xf32, #tpu.memory_space<vmem>>, vector<32x2xf32>
    %cst_8 = arith.constant dense<0.000000e+00> : vector<128x2xf32>
    %9 = tpu.matmul %7, %8, %cst_8 {dimension_numbers = #tpu.dot_dimension_numbers<[1], [0], [0], [1], [0, 0, 1, 1], [], []>} : vector<128x32xf32>, vector<32x2xf32>, vector<128x2xf32> -> vector<128x2xf32>
    %c0_9 = arith.constant 0 : index
    %c0_10 = arith.constant 0 : index
    %10 = vector.load %arg5[%c0_9, %c0_10] : memref<1x2xf32, #tpu.memory_space<vmem>>, vector<1x2xf32>
    %11 = vector.broadcast %10 : vector<1x2xf32> to vector<128x2xf32>
    %12 = arith.addf %9, %11 : vector<128x2xf32>
    %13 = math.exp %12 : vector<128x2xf32>
    %c0_11 = arith.constant 0 : index
    %c0_12 = arith.constant 0 : index
    %14 = vector.load %arg6[%c0_11, %c0_12] : memref<128x2xf32, #tpu.memory_space<vmem>>, vector<128x2xf32>
    tpu.vector_store %arg6[%c0_11, %c0_12], %13 {strides = array<i32>} : memref<128x2xf32, #tpu.memory_space<vmem>>, vector<128x2xf32>,
    return
  }
  func.func @transform_0(%arg0: i32) -> (i32, i32) {
    %c0_i32 = arith.constant 0 : i32
    %c0_i32_0 = arith.constant 0 : i32
    return %arg0, %c0_i32 : i32, i32
  }
  func.func @transform_1(%arg0: i32) -> (i32, i32) {
    %c0_i32 = arith.constant 0 : i32
    %c0_i32_0 = arith.constant 0 : i32
    %c0_i32_1 = arith.constant 0 : i32
    return %c0_i32, %c0_i32_0 : i32, i32
  }
  func.func @transform_2(%arg0: i32) -> (i32, i32) {
    %c0_i32 = arith.constant 0 : i32
    %c0_i32_0 = arith.constant 0 : i32
    %c0_i32_1 = arith.constant 0 : i32
    return %c0_i32, %c0_i32_0 : i32, i32
  }
  func.func @transform_3(%arg0: i32) -> (i32, i32) {
    %c0_i32 = arith.constant 0 : i32
    %c0_i32_0 = arith.constant 0 : i32
    %c0_i32_1 = arith.constant 0 : i32
    return %c0_i32, %c0_i32_0 : i32, i32
  }
  func.func @transform_4(%arg0: i32) -> (i32, i32) {
    %c0_i32 = arith.constant 0 : i32
    %c0_i32_0 = arith.constant 0 : i32
    %c0_i32_1 = arith.constant 0 : i32
    return %c0_i32, %c0_i32_0 : i32, i32
  }
  func.func @transform_5(%arg0: i32) -> (i32, i32) {
    %c0_i32 = arith.constant 0 : i32
    %c0_i32_0 = arith.constant 0 : i32
    return %arg0, %c0_i32 : i32, i32
  }
}

</mosaic_0001>

<bundles_post_ra>
// kernel: tpu_custom_call.1
= control target key start
LH: loop header
LB: loop body
LE: loop exit
PB: predicated region body
PF: predicated region fallthrough
CT: control target
= control target key end

     0   :  { %vm45_vm0 = vcmask 130048   ;;  %vm266_vm1 = vcmask 261120   ;;  %vm492_vm2 = vcmask 15360   ;;  %s893_s1 = inlined_call_operand.vmem [shape: f32[16,32], index: 1, kind: input, shape index: {}]   ;;  %s894_s0 = inlined_call_operand.vmem [shape: f32[128,16], index: 0, kind: input, shape index: {}]   ;;  %s895_s3 = inlined_call_operand.vmem [shape: f32[32,2], index: 3, kind: input, shape index: {}]   ;;  %s896_s2 = inlined_call_operand.vmem [shape: f32[1,32], index: 2, kind: input, shape index: {}]   ;;  %s897_s4 = inlined_call_operand.vmem [shape: f32[1,2], index: 4, kind: input, shape index: {}]   ;;  %s898_s5 = inlined_call_operand.vmem [shape: f32[128,2], index: 5, kind: output, shape index: {}]  }
   0x1   :  { %v37_v0 = vld [vmem:[%s893_s1 + $0x8] sm:$0xff]  ;;  %v36_v1 = vld [vmem:[%s893_s1] sm:$0xff]  ;;  %v22_v4 = vld [vmem:[%s894_s0 + $0x10] sm:$0xff] }
   0x2   :  { %v20_v2 = vld [vmem:[%s894_s0] sm:$0xff]  ;;  %585 = vmatprep.subr.mxu0 %v37_v0  ;;  %v21_v3 = vld [vmem:[%s894_s0 + $0x8] sm:$0xff]  ;;  %v23_v5 = vld [vmem:[%s894_s0 + $0x18] sm:$0xff] }
   0x3   :  { %589 = vmatprep.mubr.msk.f32.mxu0 %vm45_vm0, %v20_v2  ;;  %586 = vmatpush3.msra.mxu0 %v37_v0  ;;  %v24_v6 = vld [vmem:[%s894_s0 + $0x20] sm:$0xff]  ;;  %v25_v7 = vld [vmem:[%s894_s0 + $0x28] sm:$0xff]  ;;  %v26_v8 = vld [vmem:[%s894_s0 + $0x30] sm:$0xff] }
   0x4   :  { %587 = vmatprep.subr.mxu0 %v36_v1  ;;  %v27_v9 = vld [vmem:[%s894_s0 + $0x38] sm:$0xff]  ;;  %v28_v10 = vld [vmem:[%s894_s0 + $0x40] sm:$0xff]  ;;  %v29_v11 = vld [vmem:[%s894_s0 + $0x48] sm:$0xff] }
   0x5   :  { %588 = vmatpush3.msra.mxu0 %v36_v1  ;;  %v30_v12 = vld [vmem:[%s894_s0 + $0x50] sm:$0xff]  ;;  %v31_v13 = vld [vmem:[%s894_s0 + $0x58] sm:$0xff]  ;;  %v32_v14 = vld [vmem:[%s894_s0 + $0x60] sm:$0xff] }
   0x6   :  { %590 = vmatmul.mubr.msk.f32.vlgmr.msra.gmra.mxu0 %vm45_vm0, %v21_v3  ;;  %v33_v15 = vld [vmem:[%s894_s0 + $0x68] sm:$0xff]  ;;  %v34_v16 = vld [vmem:[%s894_s0 + $0x70] sm:$0xff]  ;;  %v35_v17 = vld [vmem:[%s894_s0 + $0x78] sm:$0xff] }
   0x7   :  { %592 = vmatprep.mubr.msk.f32.mxu0 %vm45_vm0, %v22_v4  ;;  %v258_v18 = vld [vmem:[%s895_s3 + $0x18] sm:$0xff]  ;;  %v257_v19 = vld [vmem:[%s895_s3 + $0x10] sm:$0xff]  ;;  %v256_v20 = vld [vmem:[%s895_s3 + $0x8] sm:$0xff] }
   0x8   :  { %613 = vmatprep.subr.mxu1 %v258_v18  ;;  %v255_v21 = vld [vmem:[%s895_s3] sm:$0xff] }
   0x9   :  { %614 = vmatpush3.msra.mxu1 %v258_v18  ;;  %v513_v22 = vld [vmem:[%s896_s2] ss:$0 sm:$0xff] }
   0xa   :  { %593 = vmatmul.mubr.msk.f32.gmra.mxu0 %vm45_vm0, %v23_v5  ;;  %615 = vmatprep.subr.mxu1 %v257_v19 }
   0xb   :  { %595 = vmatprep.mubr.msk.f32.mxu0 %vm45_vm0, %v24_v6  ;;  %616 = vmatpush3.msra.mxu1 %v257_v19 }
   0xc   :  { %617 = vmatprep.subr.mxu1 %v256_v20 }
   0xd   :  { %618 = vmatpush3.msra.mxu1 %v256_v20 }
   0xe   :  { %596 = vmatmul.mubr.msk.f32.gmra.mxu0 %vm45_vm0, %v25_v7  ;;  %619 = vmatprep.subr.mxu1 %v255_v21  ;;  %v811_v7 = vld [vmem:[%s897_s4] ss:$0 sm:$0xff] }
   0xf   :  { %598 = vmatprep.mubr.msk.f32.mxu0 %vm45_vm0, %v26_v8  ;;  %620 = vmatpush3.msra.mxu1 %v255_v21 }
  0x12   :  { %599 = vmatmul.mubr.msk.f32.gmra.mxu0 %vm45_vm0, %v27_v9 }
  0x13   :  { %601 = vmatprep.mubr.msk.f32.mxu0 %vm45_vm0, %v28_v10 }
  0x16   :  { %602 = vmatmul.mubr.msk.f32.gmra.mxu0 %vm45_vm0, %v29_v11 }
  0x17   :  { %604 = vmatprep.mubr.msk.f32.mxu0 %vm45_vm0, %v30_v12 }
  0x1a   :  { %605 = vmatmul.mubr.msk.f32.gmra.mxu0 %vm45_vm0, %v31_v13 }
  0x1b   :  { %607 = vmatprep.mubr.msk.f32.mxu0 %vm45_vm0, %v32_v14 }
  0x1e   :  { %608 = vmatmul.mubr.msk.f32.gmra.mxu0 %vm45_vm0, %v33_v15 }
  0x1f   :  { %610 = vmatprep.mubr.msk.f32.mxu0 %vm45_vm0, %v34_v16 }
  0x22   :  { %611 = vmatmul.mubr.msk.f32.gmra.mxu0 %vm45_vm0, %v35_v17 }
  0xc6   :  { %v591_v23 = vpop.f32.mrf.mxu0 }
  0xc7   :  { %v166_v24 = vadd.f32 %v591_v23, %v513_v22 }
  0xc8   :  { %v160_v25 = vpop.f32.mrf.mxu0 }
  0xc9   :  { %v161_v26 = vadd.f32 %v513_v22, %v160_v25  ;;  %v240_v29 = vmax.f32 %v166_v24, 0.0 }
  0xca   :  { %v594_v27 = vpop.f32.mrf.mxu0 }
  0xcb   :  { %v239_v28 = vmax.f32 %v161_v26, 0.0  ;;  %v176_v30 = vadd.f32 %v594_v27, %v513_v22 }
  0xcc   :  { %v170_v31 = vpop.f32.mrf.mxu0 }
  0xcd   :  { %v171_v32 = vadd.f32 %v513_v22, %v170_v31  ;;  %621 = vmatprep.mubr.msk.f32.mxu1 %vm266_vm1, %v239_v28  ;;  %v242_v35 = vmax.f32 %v176_v30, 0.0 }
  0xce   :  { %v597_v33 = vpop.f32.mrf.mxu0  ;;  %622 = vmatmul.mubr.msk.f32.vlgmr.msra.gmra.mxu1 %vm266_vm1, %v240_v29 }
  0xcf   :  { %v241_v34 = vmax.f32 %v171_v32, 0.0  ;;  %v186_v36 = vadd.f32 %v597_v33, %v513_v22 }
  0xd0   :  { %v180_v37 = vpop.f32.mrf.mxu0 }
  0xd1   :  { %v181_v38 = vadd.f32 %v513_v22, %v180_v37  ;;  %624 = vmatprep.mubr.msk.f32.mxu1 %vm266_vm1, %v241_v34  ;;  %v244_v41 = vmax.f32 %v186_v36, 0.0 }
  0xd2   :  { %v600_v39 = vpop.f32.mrf.mxu0  ;;  %625 = vmatmul.mubr.msk.f32.gmra.mxu1 %vm266_vm1, %v242_v35 }
  0xd3   :  { %v243_v40 = vmax.f32 %v181_v38, 0.0  ;;  %v196_v42 = vadd.f32 %v600_v39, %v513_v22 }
  0xd4   :  { %v190_v43 = vpop.f32.mrf.mxu0 }
  0xd5   :  { %v191_v44 = vadd.f32 %v513_v22, %v190_v43  ;;  %627 = vmatprep.mubr.msk.f32.mxu1 %vm266_vm1, %v243_v40  ;;  %v246_v47 = vmax.f32 %v196_v42, 0.0 }
  0xd6   :  { %v603_v45 = vpop.f32.mrf.mxu0  ;;  %628 = vmatmul.mubr.msk.f32.gmra.mxu1 %vm266_vm1, %v244_v41 }
  0xd7   :  { %v245_v46 = vmax.f32 %v191_v44, 0.0  ;;  %v206_v48 = vadd.f32 %v603_v45, %v513_v22 }
  0xd8   :  { %v200_v49 = vpop.f32.mrf.mxu0 }
  0xd9   :  { %v201_v50 = vadd.f32 %v513_v22, %v200_v49  ;;  %630 = vmatprep.mubr.msk.f32.mxu1 %vm266_vm1, %v245_v46  ;;  %v248_v53 = vmax.f32 %v206_v48, 0.0 }
  0xda   :  { %v606_v51 = vpop.f32.mrf.mxu0  ;;  %631 = vmatmul.mubr.msk.f32.gmra.mxu1 %vm266_vm1, %v246_v47 }
  0xdb   :  { %v247_v52 = vmax.f32 %v201_v50, 0.0  ;;  %v216_v54 = vadd.f32 %v606_v51, %v513_v22 }
  0xdc   :  { %v210_v55 = vpop.f32.mrf.mxu0 }
  0xdd   :  { %v211_v56 = vadd.f32 %v513_v22, %v210_v55  ;;  %633 = vmatprep.mubr.msk.f32.mxu1 %vm266_vm1, %v247_v52  ;;  %v250_v59 = vmax.f32 %v216_v54, 0.0 }
  0xde   :  { %v609_v57 = vpop.f32.mrf.mxu0  ;;  %634 = vmatmul.mubr.msk.f32.gmra.mxu1 %vm266_vm1, %v248_v53 }
  0xdf   :  { %v249_v58 = vmax.f32 %v211_v56, 0.0  ;;  %v226_v60 = vadd.f32 %v609_v57, %v513_v22 }
  0xe0   :  { %v220_v61 = vpop.f32.mrf.mxu0 }
  0xe1   :  { %v221_v62 = vadd.f32 %v513_v22, %v220_v61  ;;  %636 = vmatprep.mubr.msk.f32.mxu1 %vm266_vm1, %v249_v58  ;;  %v252_v1 = vmax.f32 %v226_v60, 0.0 }
  0xe2   :  { %v612_v63 = vpop.f32.mrf.mxu0  ;;  %637 = vmatmul.mubr.msk.f32.gmra.mxu1 %vm266_vm1, %v250_v59 }
  0xe3   :  { %v251_v0 = vmax.f32 %v221_v62, 0.0  ;;  %v236_v2 = vadd.f32 %v612_v63, %v513_v22 }
  0xe4   :  { %v230_v3 = vpop.f32.mrf.mxu0 }
  0xe5   :  { %v231_v4 = vadd.f32 %v513_v22, %v230_v3  ;;  %639 = vmatprep.mubr.msk.f32.mxu1 %vm266_vm1, %v251_v0  ;;  %v254_v6 = vmax.f32 %v236_v2, 0.0 }
  0xe6   :  { %640 = vmatmul.mubr.msk.f32.gmra.mxu1 %vm266_vm1, %v252_v1 }
  0xe7   :  { %v253_v5 = vmax.f32 %v231_v4, 0.0 }
  0xe9   :  { %642 = vmatprep.mubr.msk.f32.mxu1 %vm266_vm1, %v253_v5 }
  0xea   :  { %643 = vmatmul.mubr.msk.f32.gmra.mxu1 %vm266_vm1, %v254_v6 }
 0x18e   :  { %v623_v8 = vpop.f32.mrf.mxu1 }
 0x18f   :  { %v387_v9 = vadd.f32 %v623_v8, %v811_v7 }
 0x190   :  { %v381_v10 = vpop.f32.mrf.mxu1 }
 0x191   :  { %v462_v11 = vmul.f32 1.442695, %v387_v9  ;;  %v382_v12 = vadd.f32 %v811_v7, %v381_v10 }
 0x192   :  { %v626_v13 = vpop.f32.mrf.mxu1 }
 0x193   :  { %645 = vpow2.f32 %v462_v11  ;;  %v460_v14 = vmul.f32 1.442695, %v382_v12  ;;  %v397_v15 = vadd.f32 %v626_v13, %v811_v7 }
 0x194   :  { %v391_v16 = vpop.f32.mrf.mxu1 }
 0x195   :  { %647 = vpow2.f32 %v460_v14  ;;  %v466_v17 = vmul.f32 1.442695, %v397_v15  ;;  %v392_v18 = vadd.f32 %v811_v7, %v391_v16 }
 0x196   :  { %v629_v19 = vpop.f32.mrf.mxu1 }
 0x197   :  { %649 = vpow2.f32 %v466_v17  ;;  %v464_v20 = vmul.f32 1.442695, %v392_v18  ;;  %v407_v21 = vadd.f32 %v629_v19, %v811_v7 }
 0x198   :  { %v401_v22 = vpop.f32.mrf.mxu1 }
 0x199   :  { %651 = vpow2.f32 %v464_v20  ;;  %v470_v23 = vmul.f32 1.442695, %v407_v21  ;;  %v402_v24 = vadd.f32 %v811_v7, %v401_v22 }
 0x19a   :  { %v632_v25 = vpop.f32.mrf.mxu1 }
 0x19b   :  { %653 = vpow2.f32 %v470_v23  ;;  %v468_v26 = vmul.f32 1.442695, %v402_v24  ;;  %v417_v27 = vadd.f32 %v632_v25, %v811_v7 }
 0x19c   :  { %v411_v28 = vpop.f32.mrf.mxu1 }
 0x19d   :  { %655 = vpow2.f32 %v468_v26  ;;  %v474_v29 = vmul.f32 1.442695, %v417_v27  ;;  %v412_v30 = vadd.f32 %v811_v7, %v411_v28 }
 0x19e   :  { %v635_v31 = vpop.f32.mrf.mxu1 }
 0x19f   :  { %657 = vpow2.f32 %v474_v29  ;;  %v472_v32 = vmul.f32 1.442695, %v412_v30  ;;  %v427_v33 = vadd.f32 %v635_v31, %v811_v7 }
 0x1a0   :  { %v646_v34 = vpop.eup %645  ;;  %v421_v35 = vpop.f32.mrf.mxu1 }
 0x1a1   :  { %494 = vst.msk [vmem:[%s898_s5 + $0x8] sm:$0xff] %vm492_vm2, %v646_v34  ;;  %659 = vpow2.f32 %v472_v32  ;;  %v478_v36 = vmul.f32 1.442695, %v427_v33  ;;  %v422_v37 = vadd.f32 %v811_v7, %v421_v35 }
 0x1a2   :  { %v648_v38 = vpop.eup %647  ;;  %v638_v39 = vpop.f32.mrf.mxu1 }
 0x1a3   :  { %493 = vst.msk [vmem:[%s898_s5] sm:$0xff] %vm492_vm2, %v648_v38  ;;  %661 = vpow2.f32 %v478_v36  ;;  %v476_v40 = vmul.f32 1.442695, %v422_v37  ;;  %v437_v41 = vadd.f32 %v638_v39, %v811_v7 }
 0x1a4   :  { %v650_v42 = vpop.eup %649  ;;  %v431_v43 = vpop.f32.mrf.mxu1 }
 0x1a5   :  { %496 = vst.msk [vmem:[%s898_s5 + $0x18] sm:$0xff] %vm492_vm2, %v650_v42  ;;  %663 = vpow2.f32 %v476_v40  ;;  %v482_v44 = vmul.f32 1.442695, %v437_v41  ;;  %v432_v45 = vadd.f32 %v811_v7, %v431_v43 }
 0x1a6   :  { %v652_v46 = vpop.eup %651  ;;  %v641_v47 = vpop.f32.mrf.mxu1 }
 0x1a7   :  { %495 = vst.msk [vmem:[%s898_s5 + $0x10] sm:$0xff] %vm492_vm2, %v652_v46  ;;  %665 = vpow2.f32 %v482_v44  ;;  %v480_v48 = vmul.f32 1.442695, %v432_v45  ;;  %v447_v49 = vadd.f32 %v641_v47, %v811_v7 }
 0x1a8   :  { %v654_v50 = vpop.eup %653  ;;  %v441_v51 = vpop.f32.mrf.mxu1 }
 0x1a9   :  { %498 = vst.msk [vmem:[%s898_s5 + $0x28] sm:$0xff] %vm492_vm2, %v654_v50  ;;  %667 = vpow2.f32 %v480_v48  ;;  %v486_v52 = vmul.f32 1.442695, %v447_v49  ;;  %v442_v53 = vadd.f32 %v811_v7, %v441_v51 }
 0x1aa   :  { %v656_v54 = vpop.eup %655  ;;  %v644_v55 = vpop.f32.mrf.mxu1 }
 0x1ab   :  { %497 = vst.msk [vmem:[%s898_s5 + $0x20] sm:$0xff] %vm492_vm2, %v656_v54  ;;  %669 = vpow2.f32 %v486_v52  ;;  %v484_v56 = vmul.f32 1.442695, %v442_v53  ;;  %v457_v57 = vadd.f32 %v644_v55, %v811_v7 }
 0x1ac   :  { %v658_v58 = vpop.eup %657  ;;  %v451_v59 = vpop.f32.mrf.mxu1 }
 0x1ad   :  { %500 = vst.msk [vmem:[%s898_s5 + $0x38] sm:$0xff] %vm492_vm2, %v658_v58  ;;  %671 = vpow2.f32 %v484_v56  ;;  %v490_v60 = vmul.f32 1.442695, %v457_v57  ;;  %v452_v61 = vadd.f32 %v811_v7, %v451_v59 }
 0x1ae   :  { %v660_v62 = vpop.eup %659 }
 0x1af   :  { %499 = vst.msk [vmem:[%s898_s5 + $0x30] sm:$0xff] %vm492_vm2, %v660_v62  ;;  %673 = vpow2.f32 %v490_v60  ;;  %v488_v63 = vmul.f32 1.442695, %v452_v61 }
 0x1b0   :  { %v662_v0 = vpop.eup %661 }
 0x1b1   :  { %502 = vst.msk [vmem:[%s898_s5 + $0x48] sm:$0xff] %vm492_vm2, %v662_v0  ;;  %675 = vpow2.f32 %v488_v63 }
 0x1b2   :  { %v664_v1 = vpop.eup %663 }
 0x1b3   :  { %501 = vst.msk [vmem:[%s898_s5 + $0x40] sm:$0xff] %vm492_vm2, %v664_v1 }
 0x1b4   :  { %v666_v2 = vpop.eup %665 }
 0x1b5   :  { %504 = vst.msk [vmem:[%s898_s5 + $0x58] sm:$0xff] %vm492_vm2, %v666_v2 }
 0x1b6   :  { %v668_v3 = vpop.eup %667 }
 0x1b7   :  { %503 = vst.msk [vmem:[%s898_s5 + $0x50] sm:$0xff] %vm492_vm2, %v668_v3 }
 0x1b8   :  { %v670_v4 = vpop.eup %669 }
 0x1b9   :  { %506 = vst.msk [vmem:[%s898_s5 + $0x68] sm:$0xff] %vm492_vm2, %v670_v4 }
 0x1ba   :  { %v672_v5 = vpop.eup %671 }
 0x1bb   :  { %505 = vst.msk [vmem:[%s898_s5 + $0x60] sm:$0xff] %vm492_vm2, %v672_v5 }
 0x1bc   :  { %v674_v6 = vpop.eup %673 }
 0x1bd   :  { %508 = vst.msk [vmem:[%s898_s5 + $0x78] sm:$0xff] %vm492_vm2, %v674_v6 }
 0x1be   :  { %v676_v7 = vpop.eup %675 }
 0x1bf   :  { %507 = vst.msk [vmem:[%s898_s5 + $0x70] sm:$0xff] %vm492_vm2, %v676_v7 }

</bundles_post_ra>
